<compile_context>
chip_gen: v7x
topology: tpu7x:2x2x1
jax: 0.10.0
libtpu: 0.0.40
codegen_flags: <defaults>
</compile_context>

<pallas_src>
import jax
import jax.numpy as jnp
from jax.experimental import pallas as pl
from jax.experimental.pallas import tpu as pltpu

C_IN = 20
K_PAD = 24        # C_in (20) + 1 bias row, padded up to a sublane-aligned 24
C_OUT = 480
C_OUT_PAD = 512   # 4 * 128 -> unmasked lane-dense stores on all generations


def conv1x1_kernel(x_ref, w_ref, o_ref):
    # x_ref: (N, K_PAD) bf16, w_ref: (K_PAD, C_OUT_PAD) bf16, o_ref: (N, C_OUT_PAD) f32.
    # Bias is already folded into w_ref (last live row) / the ones column of x_ref,
    # so the whole body is a single MXU dot with f32 accumulation.
    o_ref[...] = jnp.dot(
        x_ref[...], w_ref[...], preferred_element_type=jnp.float32
    ).astype(o_ref.dtype)


def prepare_conv_params(weight, bias):
    """One-time (amortized) parameter layout prep.

    weight: (C_out, C_in, 1, 1); bias: (C_out,).
    Returns w_pad: (K_PAD, C_OUT_PAD) bf16 where
      rows [0:C_in]      = W^T
      row  [C_in]        = bias   (folded into the matmul via a ones column on x)
      rows [C_in+1:K_PAD]= 0      (K padding)
      cols [C_out:]      = 0      (lane padding -> exact slice back to C_out)
    """
    c_out, c_in = weight.shape[0], weight.shape[1]
    w2d = weight.reshape(c_out, c_in).T                      # (C_in, C_out)
    w_pad = jnp.zeros((K_PAD, C_OUT_PAD), dtype=jnp.float32)
    w_pad = w_pad.at[:c_in, :c_out].set(w2d)
    w_pad = w_pad.at[c_in, :c_out].set(bias)                 # folded bias row
    return w_pad.astype(jnp.bfloat16)


def _pad_input(x_nchw):
    """(N, C_in, 1, 1) -> (N, K_PAD) bf16 with a ones column for the bias fold."""
    N, c_in, H, W = x_nchw.shape
    assert H == 1 and W == 1, "this module only sees 1x1 spatial input"
    x2d = x_nchw.reshape(N, c_in)
    x_pad = jnp.zeros((N, K_PAD), dtype=jnp.float32)
    x_pad = x_pad.at[:, :c_in].set(x2d)
    x_pad = x_pad.at[:, c_in].set(1.0)                        # bias "ones" column
    return x_pad.astype(jnp.bfloat16)


def conv2d_1x1_padded(x_nchw, w_pad):
    """Preferred fusion-friendly entry point: returns lane-dense (N, C_OUT_PAD) f32.

    Padded columns [C_OUT:] are exactly zero.
    """
    N = x_nchw.shape[0]
    x_pad = _pad_input(x_nchw)

    cost = pl.CostEstimate(
        flops=2 * N * K_PAD * C_OUT_PAD,
        transcendentals=0,
        bytes_accessed=(2 * N * K_PAD            # bf16 activations
                        + 2 * K_PAD * C_OUT_PAD  # bf16 weights (+ folded bias)
                        + 4 * N * C_OUT_PAD),    # f32 output
    )

    return pl.pallas_call(
        conv1x1_kernel,
        out_shape=jax.ShapeDtypeStruct((N, C_OUT_PAD), jnp.float32),
        in_specs=[
            pl.BlockSpec(memory_space=pltpu.MemorySpace.VMEM),
            pl.BlockSpec(memory_space=pltpu.MemorySpace.VMEM),
        ],
        out_specs=pl.BlockSpec(memory_space=pltpu.MemorySpace.VMEM),
        cost_estimate=cost,
    )(x_pad, w_pad)


def conv2d_1x1(x_nchw, w_pad):
    """Module-faithful wrapper: (N, C_in, 1, 1) -> (N, C_out, 1, 1).

    NOTE: the slice back to 480 materializes as a tiny XLA copy; downstream
    consumers that can accept the 512-wide layout should call
    conv2d_1x1_padded() instead and avoid it.
    """
    N = x_nchw.shape[0]
    out_pad = conv2d_1x1_padded(x_nchw, w_pad)
    return out_pad[:, :C_OUT].reshape(N, C_OUT, 1, 1)


if __name__ == "__main__":
    key = jax.random.PRNGKey(0)
    kx, kw, kb = jax.random.split(key, 3)

    N = 1

    # Deterministic synthetic parameters (Conv2d(20, 480, 1) shapes).
    x97 = jax.random.normal(kx, (N, C_IN, 1, 1), dtype=jnp.float32)
    weight = jax.random.normal(kw, (C_OUT, C_IN, 1, 1), dtype=jnp.float32) * 0.1
    bias = jax.random.normal(kb, (C_OUT,), dtype=jnp.float32) * 0.1

    # One-time parameter layout prep (amortized outside the hot path).
    w_pad = prepare_conv_params(weight, bias)
    w_pad = jax.block_until_ready(w_pad)

    forward = jax.jit(conv2d_1x1)
    x98 = forward(x97, w_pad)
    jax.block_until_ready(x98)

    assert x98.shape == (N, C_OUT, 1, 1)

    # Reference 1: same precision as the kernel (bf16 operands, f32 accumulate).
    xb = x97.reshape(N, C_IN).astype(jnp.bfloat16).astype(jnp.float32)
    wb = weight.reshape(C_OUT, C_IN).astype(jnp.bfloat16).astype(jnp.float32)
    bb = bias.astype(jnp.bfloat16).astype(jnp.float32)
    ref_bf16 = (xb @ wb.T + bb[None, :]).reshape(N, C_OUT, 1, 1)
    assert jnp.allclose(x98, ref_bf16, atol=1e-3, rtol=1e-3), \
        "mismatch vs precision-matched reference"

    # Reference 2: full f32 math (sanity bound on bf16 quantization error).
    ref_f32 = (x97.reshape(N, C_IN) @ weight.reshape(C_OUT, C_IN).T
               + bias[None, :]).reshape(N, C_OUT, 1, 1)
    assert jnp.allclose(x98, ref_f32, atol=3e-2, rtol=3e-2), \
        "mismatch vs f32 reference"

    # Padded output columns must be exactly zero (guarantees the slice is exact).
    out_pad = jax.jit(conv2d_1x1_padded)(x97, w_pad)
    jax.block_until_ready(out_pad)
    assert jnp.all(out_pad[:, C_OUT:] == 0.0)

    print("KERNEL_OK")
</pallas_src>

<mosaic_0001>
module attributes {stable_mosaic.version = 11 : i64} {
  func.func @conv1x1_kernel(%arg0: memref<1x24xbf16, #tpu.memory_space<vmem>>, %arg1: memref<24x512xbf16, #tpu.memory_space<vmem>>, %arg2: memref<1x512xf32, #tpu.memory_space<vmem>>) attributes {dimension_semantics = [], scalar_prefetch = 0 : i64, scratch_operands = 0 : i64, tpu.core_type = #tpu.core_type<tc>} {
    %c0 = arith.constant 0 : index
    %c0_0 = arith.constant 0 : index
    %0 = vector.load %arg0[%c0, %c0_0] : memref<1x24xbf16, #tpu.memory_space<vmem>>, vector<1x24xbf16>
    %c0_1 = arith.constant 0 : index
    %c0_2 = arith.constant 0 : index
    %1 = vector.load %arg1[%c0_1, %c0_2] : memref<24x512xbf16, #tpu.memory_space<vmem>>, vector<24x512xbf16>
    %cst = arith.constant dense<0.000000e+00> : vector<1x512xf32>
    %2 = tpu.matmul %0, %1, %cst {dimension_numbers = #tpu.dot_dimension_numbers<[1], [0], [0], [1], [0, 0, 1, 1], [], []>} : vector<1x24xbf16>, vector<24x512xbf16>, vector<1x512xf32> -> vector<1x512xf32>
    %c0_3 = arith.constant 0 : index
    %c0_4 = arith.constant 0 : index
    %3 = vector.load %arg2[%c0_3, %c0_4] : memref<1x512xf32, #tpu.memory_space<vmem>>, vector<1x512xf32>
    tpu.vector_store %arg2[%c0_3, %c0_4], %2 {strides = array<i32>} : memref<1x512xf32, #tpu.memory_space<vmem>>, vector<1x512xf32>,
    return
  }
}

</mosaic_0001>

<bundles_post_ra>
// kernel: conv2d_1x1.1
= control target key start
LH: loop header
LB: loop body
LE: loop exit
PB: predicated region body
PF: predicated region fallthrough
CT: control target
= control target key end

     0   :  { %7 = vsyncpa [#allocation3], 0  ;;  %s252_s9 = smov [#allocation2]   ;;  %s290_s0 = inlined_call_operand.vmem [shape: bf16[1,24], index: 0, kind: input, shape index: {}]   ;;  %s291_s1 = inlined_call_operand.hbm [shape: bf16[24,512], index: 1, kind: input, shape index: {}]   ;;  %s292_s2 = inlined_call_operand.vmem [shape: f32[1,512], index: 2, kind: output, shape index: {}]  }
   0x1   :  { %s15_s10 = sshll.u32 %s252_s9, 4  ;;  %s228_s13 = scalar_lea.hbm %s291_s1, 768  ;;  %s16_s10 = int_to_ptr.vmem [resolvable:$true] %s15_s10 }
   0x2   :  { %p229_p0 = scmp.ne.s32.totalorder %s291_s1, %s228_s13  ;;  %p232_p1 = scmp.lt.u32.totalorder %s228_s13, %s291_s1 }
   0x4   :  { %p234_p2 = pnand %p232_p1, %p229_p0 }
   0x6   :  { %237 = shalt.err (!%p234_p2)
}
   0x7   :  { %s238_s18 = scalar_lea.vmem %s16_s10, 768  ;;  %p243_p4 = scmp.lt.s32.totalorder %s16_s10, %s16_s10 }
   0x8   :  { %p239_p3 = scmp.ne.s32.totalorder %s16_s10, %s238_s18  ;;  %p244_p5 = scmp.lt.s32.totalorder %s238_s18, %s238_s18 }
   0xa   :  { %p245_p6 = por %p244_p5, %p243_p4 }
   0xc   :  { %p246_p7 = pnand %p245_p6, %p239_p3 }
   0xe   :  { %249 = shalt.err (!%p246_p7)
}
   0xf   :  { %s253_s19 = smov 256   ;;  %s254_s20 = smov 16  }
  0x10   :  { %21 = dma.hbm_to_vmem [thread:$0]  %s291_s1, 768, %s16_s10, [#allocation3], %s253_s19, %s253_s19, %s254_s20  }
  0x11   :  { %250 = dma.done.wait [#allocation3], 768  }
  0x12   :  { %251 = vsyncadd [#allocation3], 4294966528  ;;  %v255_v0 = vmov 0   ;;  %v218_v1 = vld [vmem:[#allocation2 + $0x4] ss:$16 sps:$4 sm:$0xff]   ;;  %vm67_vm0 = vcmask 1043456   ;;  %v171_v16 = vlaneseq }
  0x13   :  { %112 = vmatprep.mubr.bf16.mxu0 %v255_v0  ;;  %153 = vmatprep.mubr.bf16.mxu1 %v255_v0  ;;  %v220_v2 = vld [vmem:[#allocation2 + $0xc] ss:$16 sps:$4 sm:$0xff]   ;;  %v222_v3 = vld [vmem:[#allocation2] ss:$16 sps:$4 sm:$0xff]   ;;  %v223_v4 = vld [vmem:[#allocation2 + $0x8] ss:$16 sps:$4 sm:$0xff]  }
  0x14   :  { %80 = vmatprep.subr.bf16.mxu0 %v218_v1  ;;  %v31_v5 = vld [vmem:[#allocation2 + $0x20] sm:$0xff]  ;;  %121 = vmatprep.subr.bf16.mxu1 %v220_v2  ;;  %v32_v7 = vld [vmem:[#allocation2 + $0x28] sm:$0xff]  ;;  %vm63_vm1 = vcmask 195584   ;;  %v256_v14 = vmov 1966171168   ;;  %v172_v18 = vshrl.u32 %v171_v16, 7 }
  0x15   :  { %v206_v6 = vcombine.high %v31_v5, %v31_v5  ;;  %v205_v8 = vcombine.low %v31_v5, %v31_v5  ;;  %81 = vmatpush1.bf16.msra.mxu0 %v222_v3  ;;  %122 = vmatpush1.bf16.msra.mxu1 %v223_v4  ;;  %v208_v9 = vcombine.high %v32_v7, %v32_v7  ;;  %v26_v13 = vld [vmem:[%s290_s0] sm:$0x1]  ;;  %v169_v15 = vunpack.c.l.s4 %v256_v14 }
  0x16   :  { %v207_v10 = vcombine.low %v32_v7, %v32_v7  ;;  %vm193_vm2 = vcmp.lt.s32.totalorder %v171_v16, 512 }
  0x17   :  { %209 = vmatprep.subr.msk.bf16.mxu0 %vm67_vm0, %v206_v6  ;;  %v69_v11 = vsel %vm67_vm0, %v205_v8, 0  ;;  %211 = vmatprep.subr.msk.bf16.mxu1 %vm67_vm0, %v208_v9  ;;  %v170_v17 = vunpack.c.0.s8 %v169_v15 }
  0x18   :  { %v75_v12 = vsel %vm67_vm0, %v207_v10, 0 }
  0x19   :  { %83 = vmatpush1.bf16.msra.mxu0 %v69_v11  ;;  %124 = vmatpush1.bf16.msra.mxu1 %v75_v12  ;;  %v173_v21 = vsub.s32 %v170_v17, %v172_v18 }
  0x1c   :  { %210 = vmatmul.mubr.msk.bf16.vlgmr.msra.gmra.mrb[0].mxu0 %vm63_vm1, %v26_v13  ;;  %212 = vmatmul.mubr.msk.bf16.vlgmr.msra.gmra.mrb[0].mxu1 %vm63_vm1, %v26_v13 }
  0xef   :  { %v114_v19 = vpop.f32.mrb[0].mxu0  ;;  %v155_v20 = vpop.f32.mrb[0].mxu1 }
  0xf0   :  { %v116_v22 = vpop.f32.mrb[1].mxu0  ;;  %v157_v23 = vpop.f32.mrb[1].mxu1 }
  0xf1   :  { %v166_v24 = vcombine.low %v114_v19, %v116_v22  ;;  %v167_v25 = vcombine.low %v155_v20, %v157_v23  ;;  %v118_v26 = vpop.f32.mrb[2].mxu0  ;;  %v159_v27 = vpop.f32.mrb[2].mxu1 }
  0xf2   :  { %v119_v28 = vpop.f32.mrb[3].mxu0  ;;  %v160_v29 = vpop.f32.mrb[3].mxu1 }
  0xf3   :  { %v174_v30 = vrot.slane %v166_v24, %v173_v21  ;;  %v181_v31 = vrot.slane %v167_v25, %v173_v21 }
  0xf5   :  { %v182_v32 = vcombine.low %v174_v30, %v181_v31 }
  0xf7   :  { %v189_v33 = vrot.slane %v182_v32, %v173_v21 }
  0xf9   :  { %195 = vst.msk [vmem:[%s292_s2] sm:$0xf] %vm193_vm2, %v189_v33 }
  0xfa   :  { %200 = vsyncpa [#allocation3], 1 }

</bundles_post_ra>
